<compile_context>
chip_gen: v7x
topology: tpu7x:2x2x1
jax: 0.10.0
libtpu: 0.0.40
codegen_flags: <defaults>
</compile_context>

<pallas_src>
import functools

import jax
import jax.numpy as jnp
from jax import lax
from jax.experimental import pallas as pl
from jax.experimental.pallas import tpu as pltpu


def _round_up(x, m):
    return ((x + m - 1) // m) * m


def actor_critic_kernel(temp_ref, x_ref,
                        w1_ref, b1_ref, w2_ref, b2_ref,
                        wh1_ref, bh1_ref, wh2_ref, bh2_ref,
                        out_ref, *, action_dim):
    """One batch tile of the fused ActorCritic forward.

    wh1 = concat([wa1, wc1], axis=1)                 (H, 2*half)
    wh2 = block_diag(wa2, wc2), lane-padded          (2*half, OUT_PAD)
    Output slab (TB, OUT_PAD): cols [0:action_dim] = softmax probs,
    col action_dim = critic value, remaining cols = zero padding.
    """
    cd = w1_ref.dtype                      # MXU compute dtype (bf16)
    inv_temp = 1.0 / temp_ref[0, 0]        # scalar, computed once per tile

    x = x_ref[...]                         # f32 (TB, D)

    # shared_layers: Linear -> ReLU -> (Dropout=id) -> Linear -> ReLU -> (Dropout=id)
    h = jnp.dot(x.astype(cd), w1_ref[...],
                preferred_element_type=jnp.float32) + b1_ref[...]
    h = jnp.maximum(h, 0.0)
    h = jnp.dot(h.astype(cd), w2_ref[...],
                preferred_element_type=jnp.float32) + b2_ref[...]
    h = jnp.maximum(h, 0.0)

    # fused actor/critic head entry (one MXU push instead of two)
    hc = jnp.dot(h.astype(cd), wh1_ref[...],
                 preferred_element_type=jnp.float32) + bh1_ref[...]
    hc = jnp.maximum(hc, 0.0)

    # fused block-diagonal head exit -> lane-dense (TB, OUT_PAD) slab
    raw = jnp.dot(hc.astype(cd), wh2_ref[...],
                  preferred_element_type=jnp.float32) + bh2_ref[...]

    col = lax.broadcasted_iota(jnp.int32, raw.shape, 1)
    is_logit = col < action_dim

    # temperature applies to logits only; value column passes through
    scaled = jnp.where(is_logit, raw * inv_temp, raw)

    # masked, numerically-stable softmax over the logit columns
    masked = jnp.where(is_logit, scaled, jnp.float32(-1e30))
    m = jnp.max(masked, axis=-1, keepdims=True)
    e = jnp.exp(masked - m)                            # padded cols underflow to 0
    denom = jnp.sum(e, axis=-1, keepdims=True)
    probs = e * pl.reciprocal(denom, approx=False)

    out_ref[...] = jnp.where(is_logit, probs, scaled).astype(out_ref.dtype)


def init_params(key, input_dim, hidden_dim, action_dim):
    """PyTorch nn.Linear init: U(-1/sqrt(in_features), +1/sqrt(in_features)) for W and b."""
    half = hidden_dim // 2
    layers = [
        ("w1", "b1", input_dim, hidden_dim),
        ("w2", "b2", hidden_dim, hidden_dim),
        ("wa1", "ba1", hidden_dim, half),
        ("wa2", "ba2", half, action_dim),
        ("wc1", "bc1", hidden_dim, half),
        ("wc2", "bc2", half, 1),
    ]
    params = {}
    keys = jax.random.split(key, 2 * len(layers))
    for idx, (wn, bn, fin, fout) in enumerate(layers):
        bound = 1.0 / float(fin) ** 0.5
        params[wn] = jax.random.uniform(keys[2 * idx], (fin, fout),
                                        jnp.float32, -bound, bound)
        params[bn] = jax.random.uniform(keys[2 * idx + 1], (1, fout),
                                        jnp.float32, -bound, bound)
    return params


def pack_params(params, compute_dtype):
    """Fuse actor/critic head weights and lane-pad the final stage to 128."""
    half = params["wa1"].shape[1]
    action_dim = params["wa2"].shape[1]
    out_pad = _round_up(action_dim + 1, 128)

    wh1 = jnp.concatenate([params["wa1"], params["wc1"]], axis=1)   # (H, 2*half)
    bh1 = jnp.concatenate([params["ba1"], params["bc1"]], axis=1)   # (1, 2*half)

    wh2 = jnp.zeros((2 * half, out_pad), jnp.float32)
    wh2 = wh2.at[:half, :action_dim].set(params["wa2"])
    wh2 = wh2.at[half:, action_dim:action_dim + 1].set(params["wc2"])
    bh2 = jnp.zeros((1, out_pad), jnp.float32)
    bh2 = bh2.at[:, :action_dim].set(params["ba2"])
    bh2 = bh2.at[:, action_dim:action_dim + 1].set(params["bc2"])

    packed = {
        "w1": params["w1"].astype(compute_dtype), "b1": params["b1"],
        "w2": params["w2"].astype(compute_dtype), "b2": params["b2"],
        "wh1": wh1.astype(compute_dtype), "bh1": bh1,
        "wh2": wh2.astype(compute_dtype), "bh2": bh2,
    }
    return packed, action_dim, out_pad


def actor_critic_forward(x, params, temperature=1.0, *,
                         compute_dtype=jnp.bfloat16, block_b=256):
    # PyTorch-style input normalization (glue, outside the kernel)
    if x.ndim == 1:
        x = x[None, :]
    elif x.ndim == 3:
        x = x[:, 0, :] if x.shape[1] == 1 else x[:, -1, :]
    x = x.astype(jnp.float32)

    B, input_dim = x.shape
    packed, action_dim, out_pad = pack_params(params, compute_dtype)

    tb = min(block_b, max(8, _round_up(B, 8)))     # batch tile, multiple of 8
    grid = (pl.cdiv(B, tb),)

    temp = jnp.full((1, 1), temperature, dtype=jnp.float32)

    args = (temp, x,
            packed["w1"], packed["b1"], packed["w2"], packed["b2"],
            packed["wh1"], packed["bh1"], packed["wh2"], packed["bh2"])

    def resident(a):   # full block, constant index -> stays VMEM-resident across tiles
        return pl.BlockSpec(a.shape, lambda i: (0, 0))

    in_specs = [
        pl.BlockSpec((1, 1), lambda i: (0, 0),
                     memory_space=pltpu.MemorySpace.SMEM),   # temperature scalar
        pl.BlockSpec((tb, input_dim), lambda i: (i, 0)),     # x batch tile
    ] + [resident(a) for a in args[2:]]

    out_specs = pl.BlockSpec((tb, out_pad), lambda i: (i, 0))

    hidden_dim = params["w1"].shape[1]
    half = params["wa1"].shape[1]
    flops = 2 * B * (input_dim * hidden_dim + hidden_dim * hidden_dim
                     + hidden_dim * 2 * half + 2 * half * out_pad)
    bytes_accessed = sum(int(a.size) * a.dtype.itemsize for a in args) + B * out_pad * 4
    cost = pl.CostEstimate(flops=flops, transcendentals=B * out_pad,
                           bytes_accessed=bytes_accessed)

    out = pl.pallas_call(
        functools.partial(actor_critic_kernel, action_dim=action_dim),
        out_shape=jax.ShapeDtypeStruct((B, out_pad), jnp.float32),
        grid=grid,
        in_specs=in_specs,
        out_specs=out_specs,
        compiler_params=pltpu.CompilerParams(
            dimension_semantics=("parallel",)),
        cost_estimate=cost,
    )(*args)

    probs = out[:, :action_dim]
    value = out[:, action_dim:action_dim + 1]
    return probs, value


def actor_critic_reference(x, params, temperature=1.0, compute_dtype=jnp.float32):
    """Pure-JAX reference (optionally applying the same bf16-input rounding)."""
    if x.ndim == 1:
        x = x[None, :]
    elif x.ndim == 3:
        x = x[:, 0, :] if x.shape[1] == 1 else x[:, -1, :]
    x = x.astype(jnp.float32)

    def mm(a, w):
        return jnp.dot(a.astype(compute_dtype), w.astype(compute_dtype),
                       preferred_element_type=jnp.float32)

    h = jnp.maximum(mm(x, params["w1"]) + params["b1"], 0.0)
    h = jnp.maximum(mm(h, params["w2"]) + params["b2"], 0.0)
    a = jnp.maximum(mm(h, params["wa1"]) + params["ba1"], 0.0)
    logits = (mm(a, params["wa2"]) + params["ba2"]) / temperature
    probs = jax.nn.softmax(logits, axis=-1)
    c = jnp.maximum(mm(h, params["wc1"]) + params["bc1"], 0.0)
    value = mm(c, params["wc2"]) + params["bc2"]
    return probs, value


if __name__ == "__main__":
    input_dim, hidden_dim, action_dim = 16, 32, 4
    batch = 2

    key = jax.random.PRNGKey(0)
    pkey, xkey = jax.random.split(key)
    params = init_params(pkey, input_dim, hidden_dim, action_dim)
    x = jax.random.normal(xkey, (batch, input_dim), dtype=jnp.float32)

    probs, value = actor_critic_forward(x, params, temperature=1.0)
    jax.block_until_ready((probs, value))

    assert probs.shape == (batch, action_dim) and value.shape == (batch, 1)

    # parity vs. a reference doing the same bf16-input / f32-accumulate matmuls
    p_ref, v_ref = actor_critic_reference(x, params, 1.0, compute_dtype=jnp.bfloat16)
    assert jnp.allclose(probs, p_ref, atol=2e-5, rtol=2e-5)
    assert jnp.allclose(value, v_ref, atol=2e-5, rtol=2e-5)

    # sanity vs. pure-f32 math (difference = bf16 input rounding only)
    p32, v32 = actor_critic_reference(x, params, 1.0, compute_dtype=jnp.float32)
    assert jnp.allclose(probs, p32, atol=2e-2, rtol=2e-2)
    assert jnp.allclose(value, v32, atol=2e-2, rtol=2e-2)

    assert jnp.allclose(jnp.sum(probs, axis=-1), 1.0, atol=1e-5)

    # exercise the batch-grid / pipelined path (grid > 1) with a temperature != 1
    xb = jax.random.normal(jax.random.PRNGKey(1), (64, input_dim), dtype=jnp.float32)
    pb, vb = actor_critic_forward(xb, params, temperature=0.5, block_b=16)
    jax.block_until_ready((pb, vb))
    pb_ref, vb_ref = actor_critic_reference(xb, params, 0.5, compute_dtype=jnp.bfloat16)
    assert jnp.allclose(pb, pb_ref, atol=2e-5, rtol=2e-5)
    assert jnp.allclose(vb, vb_ref, atol=2e-5, rtol=2e-5)
    assert jnp.allclose(jnp.sum(pb, axis=-1), 1.0, atol=1e-5)

    print("KERNEL_OK")
</pallas_src>

<mosaic_0001>
module attributes {stable_mosaic.version = 11 : i64} {
  func.func @actor_critic_kernel(%arg0: i32, %arg1: memref<1x1xf32, #tpu.memory_space<smem>>, %arg2: memref<8x16xf32, #tpu.memory_space<vmem>>, %arg3: memref<16x32xbf16, #tpu.memory_space<vmem>>, %arg4: memref<1x32xf32, #tpu.memory_space<vmem>>, %arg5: memref<32x32xbf16, #tpu.memory_space<vmem>>, %arg6: memref<1x32xf32, #tpu.memory_space<vmem>>, %arg7: memref<32x32xbf16, #tpu.memory_space<vmem>>, %arg8: memref<1x32xf32, #tpu.memory_space<vmem>>, %arg9: memref<32x128xbf16, #tpu.memory_space<vmem>>, %arg10: memref<1x128xf32, #tpu.memory_space<vmem>>, %arg11: memref<8x128xf32, #tpu.memory_space<vmem>>) attributes {dimension_semantics = [#tpu.dimension_semantics<parallel>], iteration_bounds = array<i64: 1>, scalar_prefetch = 0 : i64, scratch_operands = 0 : i64, tpu.core_type = #tpu.core_type<tc>, window_params = [{transform_indices = @transform_0, window_bounds = array<i64: 1, 1>}, {transform_indices = @transform_1, window_bounds = array<i64: 8, 16>}, {pipeline_mode = #tpu.pipeline_mode<synchronous>, transform_indices = @transform_2, window_bounds = array<i64: 16, 32>}, {pipeline_mode = #tpu.pipeline_mode<synchronous>, transform_indices = @transform_3, window_bounds = array<i64: 1, 32>}, {pipeline_mode = #tpu.pipeline_mode<synchronous>, transform_indices = @transform_4, window_bounds = array<i64: 32, 32>}, {pipeline_mode = #tpu.pipeline_mode<synchronous>, transform_indices = @transform_5, window_bounds = array<i64: 1, 32>}, {pipeline_mode = #tpu.pipeline_mode<synchronous>, transform_indices = @transform_6, window_bounds = array<i64: 32, 32>}, {pipeline_mode = #tpu.pipeline_mode<synchronous>, transform_indices = @transform_7, window_bounds = array<i64: 1, 32>}, {pipeline_mode = #tpu.pipeline_mode<synchronous>, transform_indices = @transform_8, window_bounds = array<i64: 32, 128>}, {pipeline_mode = #tpu.pipeline_mode<synchronous>, transform_indices = @transform_9, window_bounds = array<i64: 1, 128>}, {transform_indices = @transform_10, window_bounds = array<i64: 8, 128>}]} {
    %c0 = arith.constant 0 : index
    %c0_0 = arith.constant 0 : index
    %0 = memref.load %arg1[%c0, %c0_0] : memref<1x1xf32, #tpu.memory_space<smem>>
    %cst = arith.constant 1.000000e+00 : f32
    %1 = arith.divf %cst, %0 : f32
    %c0_1 = arith.constant 0 : index
    %c0_2 = arith.constant 0 : index
    %2 = vector.load %arg2[%c0_1, %c0_2] : memref<8x16xf32, #tpu.memory_space<vmem>>, vector<8x16xf32>
    %3 = arith.truncf %2 : vector<8x16xf32> to vector<8x16xbf16>
    %c0_3 = arith.constant 0 : index
    %c0_4 = arith.constant 0 : index
    %4 = vector.load %arg3[%c0_3, %c0_4] : memref<16x32xbf16, #tpu.memory_space<vmem>>, vector<16x32xbf16>
    %cst_5 = arith.constant dense<0.000000e+00> : vector<8x32xf32>
    %5 = tpu.matmul %3, %4, %cst_5 {dimension_numbers = #tpu.dot_dimension_numbers<[1], [0], [0], [1], [0, 0, 1, 1], [], []>} : vector<8x16xbf16>, vector<16x32xbf16>, vector<8x32xf32> -> vector<8x32xf32>
    %c0_6 = arith.constant 0 : index
    %c0_7 = arith.constant 0 : index
    %6 = vector.load %arg4[%c0_6, %c0_7] : memref<1x32xf32, #tpu.memory_space<vmem>>, vector<1x32xf32>
    %7 = vector.broadcast %6 : vector<1x32xf32> to vector<8x32xf32>
    %8 = arith.addf %5, %7 : vector<8x32xf32>
    %cst_8 = arith.constant 0.000000e+00 : f32
    %9 = vector.broadcast %cst_8 : f32 to vector<8x32xf32>
    %10 = arith.maximumf %8, %9 : vector<8x32xf32>
    %11 = arith.truncf %10 : vector<8x32xf32> to vector<8x32xbf16>
    %c0_9 = arith.constant 0 : index
    %c0_10 = arith.constant 0 : index
    %12 = vector.load %arg5[%c0_9, %c0_10] : memref<32x32xbf16, #tpu.memory_space<vmem>>, vector<32x32xbf16>
    %cst_11 = arith.constant dense<0.000000e+00> : vector<8x32xf32>
    %13 = tpu.matmul %11, %12, %cst_11 {dimension_numbers = #tpu.dot_dimension_numbers<[1], [0], [0], [1], [0, 0, 1, 1], [], []>} : vector<8x32xbf16>, vector<32x32xbf16>, vector<8x32xf32> -> vector<8x32xf32>
    %c0_12 = arith.constant 0 : index
    %c0_13 = arith.constant 0 : index
    %14 = vector.load %arg6[%c0_12, %c0_13] : memref<1x32xf32, #tpu.memory_space<vmem>>, vector<1x32xf32>
    %15 = vector.broadcast %14 : vector<1x32xf32> to vector<8x32xf32>
    %16 = arith.addf %13, %15 : vector<8x32xf32>
    %cst_14 = arith.constant 0.000000e+00 : f32
    %17 = vector.broadcast %cst_14 : f32 to vector<8x32xf32>
    %18 = arith.maximumf %16, %17 : vector<8x32xf32>
    %19 = arith.truncf %18 : vector<8x32xf32> to vector<8x32xbf16>
    %c0_15 = arith.constant 0 : index
    %c0_16 = arith.constant 0 : index
    %20 = vector.load %arg7[%c0_15, %c0_16] : memref<32x32xbf16, #tpu.memory_space<vmem>>, vector<32x32xbf16>
    %cst_17 = arith.constant dense<0.000000e+00> : vector<8x32xf32>
    %21 = tpu.matmul %19, %20, %cst_17 {dimension_numbers = #tpu.dot_dimension_numbers<[1], [0], [0], [1], [0, 0, 1, 1], [], []>} : vector<8x32xbf16>, vector<32x32xbf16>, vector<8x32xf32> -> vector<8x32xf32>
    %c0_18 = arith.constant 0 : index
    %c0_19 = arith.constant 0 : index
    %22 = vector.load %arg8[%c0_18, %c0_19] : memref<1x32xf32, #tpu.memory_space<vmem>>, vector<1x32xf32>
    %23 = vector.broadcast %22 : vector<1x32xf32> to vector<8x32xf32>
    %24 = arith.addf %21, %23 : vector<8x32xf32>
    %cst_20 = arith.constant 0.000000e+00 : f32
    %25 = vector.broadcast %cst_20 : f32 to vector<8x32xf32>
    %26 = arith.maximumf %24, %25 : vector<8x32xf32>
    %27 = arith.truncf %26 : vector<8x32xf32> to vector<8x32xbf16>
    %c0_21 = arith.constant 0 : index
    %c0_22 = arith.constant 0 : index
    %28 = vector.load %arg9[%c0_21, %c0_22] : memref<32x128xbf16, #tpu.memory_space<vmem>>, vector<32x128xbf16>
    %cst_23 = arith.constant dense<0.000000e+00> : vector<8x128xf32>
    %29 = tpu.matmul %27, %28, %cst_23 {dimension_numbers = #tpu.dot_dimension_numbers<[1], [0], [0], [1], [0, 0, 1, 1], [], []>} : vector<8x32xbf16>, vector<32x128xbf16>, vector<8x128xf32> -> vector<8x128xf32>
    %c0_24 = arith.constant 0 : index
    %c0_25 = arith.constant 0 : index
    %30 = vector.load %arg10[%c0_24, %c0_25] : memref<1x128xf32, #tpu.memory_space<vmem>>, vector<1x128xf32>
    %31 = vector.broadcast %30 : vector<1x128xf32> to vector<8x128xf32>
    %32 = arith.addf %29, %31 : vector<8x128xf32>
    %33 = tpu.iota {dimensions = array<i32: 1>} : vector<8x128xi32>
    %c4_i32 = arith.constant 4 : i32
    %34 = vector.broadcast %c4_i32 : i32 to vector<8x128xi32>
    %35 = arith.cmpi slt, %33, %34 : vector<8x128xi32>
    %36 = vector.broadcast %1 : f32 to vector<8x128xf32>
    %37 = arith.mulf %32, %36 : vector<8x128xf32>
    %38 = arith.select %35, %37, %32 : vector<8x128xi1>, vector<8x128xf32>
    %cst_26 = arith.constant -1.000000e+30 : f32
    %39 = vector.broadcast %cst_26 : f32 to vector<8x128xf32>
    %40 = arith.select %35, %38, %39 : vector<8x128xi1>, vector<8x128xf32>
    %cst_27 = arith.constant dense<0xFF800000> : vector<8xf32>
    %41 = vector.multi_reduction <maximumf>, %40, %cst_27 [1] : vector<8x128xf32> to vector<8xf32>
    %42 = vector.shape_cast %41 : vector<8xf32> to vector<8x1xf32>
    %43 = vector.broadcast %42 : vector<8x1xf32> to vector<8x128xf32>
    %44 = arith.subf %40, %43 : vector<8x128xf32>
    %45 = math.exp %44 : vector<8x128xf32>
    %cst_28 = arith.constant dense<0.000000e+00> : vector<8xf32>
    %46 = vector.multi_reduction <add>, %45, %cst_28 [1] : vector<8x128xf32> to vector<8xf32>
    %47 = vector.shape_cast %46 : vector<8xf32> to vector<8x1xf32>
    %48 = tpu.reciprocal %47 : vector<8x1xf32> -> vector<8x1xf32>
    %49 = vector.broadcast %48 : vector<8x1xf32> to vector<8x128xf32>
    %50 = arith.mulf %45, %49 : vector<8x128xf32>
    %51 = arith.select %35, %50, %38 : vector<8x128xi1>, vector<8x128xf32>
    %c0_29 = arith.constant 0 : index
    %c0_30 = arith.constant 0 : index
    %52 = vector.load %arg11[%c0_29, %c0_30] : memref<8x128xf32, #tpu.memory_space<vmem>>, vector<8x128xf32>
    tpu.vector_store %arg11[%c0_29, %c0_30], %51 {strides = array<i32>} : memref<8x128xf32, #tpu.memory_space<vmem>>, vector<8x128xf32>,
    return
  }
  func.func @transform_0(%arg0: i32) -> (i32, i32) {
    %c0_i32 = arith.constant 0 : i32
    %c0_i32_0 = arith.constant 0 : i32
    %c0_i32_1 = arith.constant 0 : i32
    return %c0_i32, %c0_i32_0 : i32, i32
  }
  func.func @transform_1(%arg0: i32) -> (i32, i32) {
    %c0_i32 = arith.constant 0 : i32
    %c0_i32_0 = arith.constant 0 : i32
    return %arg0, %c0_i32 : i32, i32
  }
  func.func @transform_2(%arg0: i32) -> (i32, i32) {
    %c0_i32 = arith.constant 0 : i32
    %c0_i32_0 = arith.constant 0 : i32
    %c0_i32_1 = arith.constant 0 : i32
    return %c0_i32, %c0_i32_0 : i32, i32
  }
  func.func @transform_3(%arg0: i32) -> (i32, i32) {
    %c0_i32 = arith.constant 0 : i32
    %c0_i32_0 = arith.constant 0 : i32
    %c0_i32_1 = arith.constant 0 : i32
    return %c0_i32, %c0_i32_0 : i32, i32
  }
  func.func @transform_4(%arg0: i32) -> (i32, i32) {
    %c0_i32 = arith.constant 0 : i32
    %c0_i32_0 = arith.constant 0 : i32
    %c0_i32_1 = arith.constant 0 : i32
    return %c0_i32, %c0_i32_0 : i32, i32
  }
  func.func @transform_5(%arg0: i32) -> (i32, i32) {
    %c0_i32 = arith.constant 0 : i32
    %c0_i32_0 = arith.constant 0 : i32
    %c0_i32_1 = arith.constant 0 : i32
    return %c0_i32, %c0_i32_0 : i32, i32
  }
  func.func @transform_6(%arg0: i32) -> (i32, i32) {
    %c0_i32 = arith.constant 0 : i32
    %c0_i32_0 = arith.constant 0 : i32
    %c0_i32_1 = arith.constant 0 : i32
    return %c0_i32, %c0_i32_0 : i32, i32
  }
  func.func @transform_7(%arg0: i32) -> (i32, i32) {
    %c0_i32 = arith.constant 0 : i32
    %c0_i32_0 = arith.constant 0 : i32
    %c0_i32_1 = arith.constant 0 : i32
    return %c0_i32, %c0_i32_0 : i32, i32
  }
  func.func @transform_8(%arg0: i32) -> (i32, i32) {
    %c0_i32 = arith.constant 0 : i32
    %c0_i32_0 = arith.constant 0 : i32
    %c0_i32_1 = arith.constant 0 : i32
    return %c0_i32, %c0_i32_0 : i32, i32
  }
  func.func @transform_9(%arg0: i32) -> (i32, i32) {
    %c0_i32 = arith.constant 0 : i32
    %c0_i32_0 = arith.constant 0 : i32
    %c0_i32_1 = arith.constant 0 : i32
    return %c0_i32, %c0_i32_0 : i32, i32
  }
  func.func @transform_10(%arg0: i32) -> (i32, i32) {
    %c0_i32 = arith.constant 0 : i32
    %c0_i32_0 = arith.constant 0 : i32
    return %arg0, %c0_i32 : i32, i32
  }
}

</mosaic_0001>

<bundles_post_ra>
// kernel: tpu_custom_call.1
= control target key start
LH: loop header
LB: loop body
LE: loop exit
PB: predicated region body
PF: predicated region fallthrough
CT: control target
= control target key end

     0   :  { %16 = vsyncpa [#allocation4], 0  ;;  %s719_s0 = inlined_call_operand.<no memory space> [shape: f32[1,1], index: 0, kind: input, shape index: {}]   ;;  %s720_s1 = inlined_call_operand.vmem [shape: f32[2,16], index: 1, kind: input, shape index: {}]   ;;  %s721_s2 = inlined_call_operand.hbm [shape: bf16[16,32], index: 2, kind: input, shape index: {}]   ;;  %s722_s3 = inlined_call_operand.vmem [shape: f32[1,32], index: 3, kind: input, shape index: {}]   ;;  %s723_s4 = inlined_call_operand.hbm [shape: bf16[32,32], index: 4, kind: input, shape index: {}]   ;;  %s724_s5 = inlined_call_operand.vmem [shape: f32[1,32], index: 5, kind: input, shape index: {}]   ;;  %s725_s6 = inlined_call_operand.vmem [shape: bf16[32,32], index: 6, kind: input, shape index: {}]   ;;  %s726_s7 = inlined_call_operand.vmem [shape: f32[1,32], index: 7, kind: input, shape index: {}]   ;;  %s727_s8 = inlined_call_operand.hbm [shape: bf16[32,128], index: 8, kind: input, shape index: {}]   ;;  %s728_s9 = inlined_call_operand.vmem [shape: f32[1,128], index: 9, kind: input, shape index: {}]   ;;  %s729_s10 = inlined_call_operand.hbm [shape: f32[2,128], index: 10, kind: output, shape index: {}]  }
   0x1   :  { %17 = vsyncpa [#allocation7], 0 }
   0x2   :  { %18 = vsyncpa [#allocation5], 0  ;;  %s559_s13 = smov [#allocation6]   ;;  %s560_s15 = smov [#allocation3]  }
   0x3   :  { %s42_s14 = sshll.u32 %s559_s13, 4  ;;  %s28_s16 = sshll.u32 %s560_s15, 4  ;;  %s43_s14 = int_to_ptr.vmem [resolvable:$true] %s42_s14  ;;  %s624_s16 = int_to_ptr.vmem [resolvable:$true] %s28_s16 }
   0x4   :  { %s465_s19 = scalar_lea.hbm %s723_s4, 256 }
   0x5   :  { %p466_p0 = scmp.ne.s32.totalorder %s723_s4, %s465_s19  ;;  %p469_p1 = scmp.lt.u32.totalorder %s465_s19, %s723_s4 }
   0x7   :  { %p471_p2 = pnand %p469_p1, %p466_p0 }
   0x9   :  { %474 = shalt.err (!%p471_p2)
}
   0xa   :  { %s475_s24 = scalar_lea.vmem %s43_s14, 256  ;;  %p480_p4 = scmp.lt.s32.totalorder %s43_s14, %s43_s14 }
   0xb   :  { %p476_p3 = scmp.ne.s32.totalorder %s43_s14, %s475_s24  ;;  %p481_p5 = scmp.lt.s32.totalorder %s475_s24, %s475_s24 }
   0xd   :  { %p482_p6 = por %p481_p5, %p480_p4 }
   0xf   :  { %p483_p7 = pnand %p482_p6, %p476_p3 }
  0x11   :  { %486 = shalt.err (!%p483_p7)
}
  0x12   :  { %s561_s25 = smov 64   ;;  %s562_s26 = smov 4  }
  0x13   :  { %48 = dma.hbm_to_vmem [thread:$0]  %s723_s4, 256, %s43_s14, [#allocation7], %s561_s25, %s561_s25, %s562_s26  }
  0x14   :  { %s487_s11 = scalar_lea.hbm %s721_s2, 128 }
  0x15   :  { %p488_p8 = scmp.ne.s32.totalorder %s721_s2, %s487_s11  ;;  %p491_p9 = scmp.lt.u32.totalorder %s487_s11, %s721_s2 }
  0x17   :  { %p493_p10 = pnand %p491_p9, %p488_p8 }
  0x19   :  { %496 = shalt.err (!%p493_p10)
}
  0x1a   :  { %s497_s18 = scalar_lea.vmem %s624_s16, 128  ;;  %p502_p12 = scmp.lt.s32.totalorder %s624_s16, %s624_s16 }
  0x1b   :  { %p498_p11 = scmp.ne.s32.totalorder %s624_s16, %s497_s18  ;;  %p503_p13 = scmp.lt.s32.totalorder %s497_s18, %s497_s18 }
  0x1d   :  { %p504_p0 = por %p503_p13, %p502_p12 }
  0x1f   :  { %p505_p1 = pnand %p504_p0, %p498_p11 }
  0x21   :  { %508 = shalt.err (!%p505_p1)
}
  0x22   :  { %34 = dma.hbm_to_vmem [thread:$0]  %s721_s2, 128, %s624_s16, [#allocation4], %s561_s25, %s561_s25, %s562_s26  }
  0x23   :  { %s563_s19 = smov [#allocation8]   ;;  %s509_s23 = scalar_lea.hbm %s727_s8, 256 }
  0x24   :  { %s60_s20 = sshll.u32 %s563_s19, 4  ;;  %p510_p2 = scmp.ne.s32.totalorder %s727_s8, %s509_s23  ;;  %s61_s20 = int_to_ptr.vmem [resolvable:$true] %s60_s20 }
  0x25   :  { %p513_p3 = scmp.lt.u32.totalorder %s509_s23, %s727_s8 }
  0x27   :  { %p515_p4 = pnand %p513_p3, %p510_p2 }
  0x29   :  { %518 = shalt.err (!%p515_p4)
}
  0x2a   :  { %s519_s30 = scalar_lea.vmem %s61_s20, 256  ;;  %p524_p6 = scmp.lt.s32.totalorder %s61_s20, %s61_s20 }
  0x2b   :  { %p520_p5 = scmp.ne.s32.totalorder %s61_s20, %s519_s30  ;;  %p525_p7 = scmp.lt.s32.totalorder %s519_s30, %s519_s30 }
  0x2d   :  { %p526_p8 = por %p525_p7, %p524_p6 }
  0x2f   :  { %p527_p9 = pnand %p526_p8, %p520_p5 }
  0x31   :  { %530 = shalt.err (!%p527_p9)
}
  0x32   :  { %66 = dma.hbm_to_vmem [thread:$0]  %s727_s8, 256, %s61_s20, [#allocation7], %s561_s25, %s561_s25, %s562_s26  }
  0x33   :  { %553 = dma.done.wait [#allocation4], 128  }
  0x34   :  { %554 = vsyncadd [#allocation4], 4294967168 }
  0x35   :  { %555 = dma.done.wait [#allocation7], 512  }
  0x36   :  { %556 = vsyncadd [#allocation7], 4294966784  ;;  %v564_v0 = vmov 0.0   ;;  %vm565_vm0 = vmmov 0   ;;  %v452_v1 = vld [vmem:[#allocation3] sm:$0xff]   ;;  %vm100_vm1 = vcmask 130048   ;;  %v80_v26 = vstv %s719_s0 }
  0x37   :  { %410 = vmatprep.subr.bf16.mxu0 %v564_v0  ;;  %412 = vmatprep.mubr.msk.bf16.mxu0 %vm565_vm0, %v564_v0  ;;  %v83_v2 = vld [vmem:[%s720_s1] sm:$0xff]  ;;  %v453_v4 = vld [vmem:[#allocation6] sm:$0xff]   ;;  %v454_v5 = vld [vmem:[#allocation6 + $0x8] sm:$0xff]   ;;  %vm169_vm2 = vcmask 261120   ;;  %459 = vrcp.f32 %v80_v26  ;;  %v349_v36 = vlaneseq }
  0x38   :  { %416 = vmatprep.subr.bf16.mxu1 %v564_v0  ;;  %420 = vmatprep.mubr.msk.bf16.mxu1 %vm565_vm0, %v564_v0  ;;  %v84_v3 = vpack.c.bf16 %v83_v2, %v83_v2  ;;  %v455_v6 = vld [vmem:[%s725_s6] sm:$0xff]   ;;  %v456_v15 = vld [vmem:[%s725_s6 + $0x8] sm:$0xff]   ;;  %v457_v16 = vld [vmem:[#allocation8] sm:$0xff]  }
  0x39   :  { %411 = vmatpush3.bf16.msra.mxu0 %v452_v1  ;;  %417 = vmatpush3.bf16.msra.mxu1 %v453_v4  ;;  %v384_v7 = vld [vmem:[%s722_s3] ss:$0 sm:$0xff]  ;;  %v350_v38 = vand.u32 127, %v349_v36 }
  0x3a   :  { %424 = vmatprep.subr.bf16.mxu0 %v564_v0  ;;  %418 = vmatprep.subr.bf16.mxu1 %v564_v0  ;;  %v387_v17 = vld [vmem:[%s724_s5] ss:$0 sm:$0xff] }
  0x3b   :  { %v458_v25 = vld [vmem:[#allocation8 + $0x8] sm:$0xff]   ;;  %vm351_vm3 = vcmp.lt.s32.totalorder %v350_v38, 4 }
  0x3c   :  { %413 = vmatmul.mubr.msk.bf16.vlgmr.msra.gmra.mrb[0].mxu0 %vm100_vm1, %v84_v3  ;;  %v391_v28 = vld [vmem:[%s726_s7] ss:$0 sm:$0xff] }
  0x3d   :  { %428 = vmatprep.mubr.msk.bf16.mxu0 %vm565_vm0, %v564_v0  ;;  %419 = vmatpush3.bf16.msra.mxu1 %v454_v5  ;;  %v395_v37 = vld [vmem:[%s728_s9] ss:$0 sm:$0xff] }
  0x3e   :  { %432 = vmatprep.subr.bf16.mxu1 %v564_v0  ;;  %425 = vmatpush3.bf16.msra.mxu0 %v455_v6 }
  0x3f   :  { %426 = vmatprep.subr.bf16.mxu0 %v564_v0 }
  0x41   :  { %v460_v27 = vpop.eup %459 }
  0x42   :  { %427 = vmatpush3.bf16.msra.mxu0 %v456_v15  ;;  %440 = vpush %v460_v27 }
  0x73   :  { %s441_s14 = spop %440 }
  0x74   :  { %v352_v40 = vstv %s441_s14 }
 0x10f   :  { %v138_v8 = vpop.f32.mrb[0].mxu0 }
 0x110   :  { %v139_v9 = vadd.f32 %v384_v7, %v138_v8  ;;  %v414_v10 = vpop.f32.mrb[1].mxu0 }
 0x111   :  { %v141_v11 = vpop.f32.mrb[2].mxu0 }
 0x112   :  { %v144_v12 = vmax.f32 %v139_v9, 0.0  ;;  %v415_v13 = vpop.f32.mrb[3].mxu0 }
 0x114   :  { %v145_v14 = vpack.c.bf16 %v144_v12, %v144_v12 }
 0x116   :  { %421 = vmatmul.mubr.msk.bf16.vlgmr.msra.gmra.mrb[0].mxu1 %vm169_vm2, %v145_v14 }
 0x117   :  { %436 = vmatprep.mubr.msk.bf16.mxu1 %vm565_vm0, %v564_v0  ;;  %433 = vmatpush3.bf16.msra.mxu1 %v457_v16 }
 0x118   :  { %434 = vmatprep.subr.bf16.mxu1 %v564_v0 }
 0x11b   :  { %435 = vmatpush3.bf16.msra.mxu1 %v458_v25 }
 0x1e9   :  { %v207_v18 = vpop.f32.mrb[0].mxu1 }
 0x1ea   :  { %v208_v19 = vadd.f32 %v387_v17, %v207_v18  ;;  %v422_v20 = vpop.f32.mrb[1].mxu1 }
 0x1eb   :  { %v210_v21 = vpop.f32.mrb[2].mxu1 }
 0x1ec   :  { %v213_v22 = vmax.f32 %v208_v19, 0.0  ;;  %v423_v23 = vpop.f32.mrb[3].mxu1 }
 0x1ee   :  { %v214_v24 = vpack.c.bf16 %v213_v22, %v213_v22 }
 0x1f0   :  { %429 = vmatmul.mubr.msk.bf16.vlgmr.msra.gmra.mrb[4].mxu0 %vm169_vm2, %v214_v24 }
 0x2c3   :  { %v275_v29 = vpop.f32.mrb[4].mxu0 }
 0x2c4   :  { %v276_v30 = vadd.f32 %v391_v28, %v275_v29  ;;  %v430_v31 = vpop.f32.mrb[5].mxu0 }
 0x2c5   :  { %v278_v32 = vpop.f32.mrb[6].mxu0 }
 0x2c6   :  { %v281_v33 = vmax.f32 %v276_v30, 0.0  ;;  %v431_v34 = vpop.f32.mrb[7].mxu0 }
 0x2c8   :  { %v282_v35 = vpack.c.bf16 %v281_v33, %v281_v33 }
 0x2ca   :  { %437 = vmatmul.mubr.msk.bf16.vlgmr.msra.gmra.mrb[4].mxu1 %vm169_vm2, %v282_v35 }
 0x39d   :  { %v343_v39 = vpop.f32.mrb[4].mxu1 }
 0x39e   :  { %v344_v41 = vadd.f32 %v395_v37, %v343_v39  ;;  %v438_v42 = vpop.f32.mrb[5].mxu1 }
 0x39f   :  { %v346_v43 = vpop.f32.mrb[6].mxu1 }
 0x3a0   :  { %v353_v44 = vmul.f32 %v352_v40, %v344_v41  ;;  %v439_v45 = vpop.f32.mrb[7].mxu1 }
 0x3a2   :  { %v354_v46 = vsel %vm351_vm3, %v353_v44, -1e+30 }
 0x3a3   :  { %355 = vmax.xlane.f32.xlu0 %v354_v46 }
 0x430   :  { %v356_v47 = vpop.xlane.xlu0 %355 }
 0x431   :  { %v357_v48 = vsub.f32 %v354_v46, %v356_v47 }
 0x433   :  { %v358_v49 = vmul.f32 1.442695, %v357_v48 }
 0x435   :  { %461 = vpow2.f32 %v358_v49 }
 0x43f   :  { %v462_v50 = vpop.eup %461 }
 0x440   :  { %360 = vadd.xlane.f32.xlu0 %v462_v50 }
 0x4cd   :  { %v361_v51 = vpop.xlane.xlu0 %360 }
 0x4ce   :  { %463 = vrcp.f32 %v361_v51 }
 0x4d8   :  { %v464_v52 = vpop.eup %463 }
 0x4d9   :  { %v363_v53 = vmul.f32 %v464_v52, %v462_v50 }
 0x4db   :  { %v364_v54 = vsel %vm351_vm3, %v363_v53, %v344_v41 }
 0x4dc   :  { %365 = vst [vmem:[#allocation9] sm:$0xff] %v364_v54 }
 0x4dd   :  { %370 = vsyncadd [#allocation5], 96  ;;  %s566_s7 = smov [#allocation9]  }
 0x4de   :  { %s371_s9 = sshll.u32 %s566_s7, 4  ;;  %s372_s9 = int_to_ptr.vmem [resolvable:$true] %s371_s9 }
 0x4df   :  { %s531_s20 = scalar_lea.vmem %s372_s9, 32  ;;  %s535_s21 = scalar_lea.vmem %s372_s9, 128 }
 0x4e0   :  { %p532_p10 = scmp.ne.s32.totalorder %s372_s9, %s531_s20  ;;  %p536_p11 = scmp.lt.s32.totalorder %s372_s9, %s372_s9 }
 0x4e1   :  { %p537_p12 = scmp.lt.s32.totalorder %s535_s21, %s531_s20 }
 0x4e3   :  { %p538_p13 = por %p537_p12, %p536_p11 }
 0x4e5   :  { %p539_p0 = pnand %p538_p13, %p532_p10 }
 0x4e7   :  { %542 = shalt.err (!%p539_p0)
}
 0x4e8   :  { %s543_s24 = scalar_lea.hbm %s729_s10, 32 }
 0x4e9   :  { %p544_p1 = scmp.ne.s32.totalorder %s729_s10, %s543_s24  ;;  %p547_p2 = scmp.lt.u32.totalorder %s543_s24, %s729_s10 }
 0x4eb   :  { %p549_p3 = pnand %p547_p2, %p544_p1 }
 0x4ed   :  { %552 = shalt.err (!%p549_p3)
}
 0x4ee   :  { %s567_s2 = smov 32   ;;  %s568_s16 = smov 2  }
 0x4ef   :  { %377 = dma.vmem_to_hbm [thread:$0]  %s372_s9, 32, %s729_s10, [#allocation5], %s567_s2, %s567_s2, %s568_s16  }
 0x4f0   :  { %557 = dma.done.wait [#allocation5], 128  }
 0x4f1   :  { %558 = vsyncadd [#allocation5], 4294967168 }
 0x4f2   :  { %381 = vsyncpa [#allocation4], 1 }
 0x4f3   :  { %382 = vsyncpa [#allocation7], 1 }
 0x4f4   :  { %383 = vsyncpa [#allocation5], 1 }

</bundles_post_ra>
